<compile_context>
chip_gen: v7x
topology: tpu7x:2x2x1
jax: 0.10.0
libtpu: 0.0.40
codegen_flags: <defaults>
</compile_context>

<pallas_src>
from functools import partial

import numpy as np
import jax
import jax.numpy as jnp
from jax.experimental import pallas as pl
from jax.experimental.pallas import tpu as pltpu


# ---------------------------------------------------------------------------
# Host-side matrix builders (deterministic, no checkpoint load).
# ---------------------------------------------------------------------------
def _bilinear_resize_matrix(out_size: int, in_size: int) -> np.ndarray:
    """1-D bilinear resize as a dense (out_size, in_size) matrix (half-pixel
    centers, align_corners=False, antialias=False)."""
    if out_size == in_size:
        return np.eye(out_size, dtype=np.float32)
    scale = in_size / out_size
    coords = (np.arange(out_size, dtype=np.float64) + 0.5) * scale - 0.5
    coords = np.clip(coords, 0.0, in_size - 1)
    lo = np.floor(coords).astype(np.int64)
    hi = np.minimum(lo + 1, in_size - 1)
    w_hi = (coords - lo).astype(np.float32)
    w_lo = (1.0 - w_hi).astype(np.float32)
    m = np.zeros((out_size, in_size), dtype=np.float32)
    m[np.arange(out_size), lo] += w_lo
    m[np.arange(out_size), hi] += w_hi
    return m


def _crop_or_pad_matrix(out_size: int, in_size: int) -> np.ndarray:
    """Center crop (out <= in) or center zero-pad (out > in) as a 0/1 matrix."""
    m = np.zeros((out_size, in_size), dtype=np.float32)
    if out_size <= in_size:
        start = (in_size - out_size) // 2
        m[np.arange(out_size), start + np.arange(out_size)] = 1.0
    else:
        start = (out_size - in_size) // 2
        m[start + np.arange(in_size), np.arange(in_size)] = 1.0
    return m


def _channel_matrix(in_c: int, out_c: int) -> np.ndarray:
    """Channel reconciliation (grayscale / identity / zero-pad) as (out_c, in_c)."""
    if out_c == in_c:
        return np.eye(out_c, dtype=np.float32)
    if out_c == 1:
        # ludwig grayscale() -> torchvision rgb_to_grayscale luma weights
        if in_c != 3:
            raise ValueError(f"grayscale expects 3 input channels, got {in_c}")
        return np.array([[0.2989, 0.5870, 0.1140]], dtype=np.float32)
    if in_c < out_c:
        # torch.nn.functional.pad(..., [0,0, 0,0, 0,extra]) -> zero extra channels
        return np.concatenate(
            [np.eye(in_c, dtype=np.float32),
             np.zeros((out_c - in_c, in_c), dtype=np.float32)], axis=0)
    raise ValueError(
        f"Number of channels cannot be reconciled. metadata.num_channels = {out_c}, "
        f"but imgs.shape[1] = {in_c}")


def _vmem_capacity_bytes() -> int:
    try:
        info = pltpu.get_tpu_info()
        cap = int(getattr(info, "vmem_capacity_bytes", 0) or 0)
        if cap > 0:
            return cap
    except Exception:
        pass
    return 64 << 20   # conservative (v7x-sized) default


# ---------------------------------------------------------------------------
# Pallas kernel: one program per batch tile.
# ---------------------------------------------------------------------------
def _image_preprocess_kernel(a_ref, rwt_ref, x_ref, o_ref, *,
                             b_tile, cihi_p, w_in, w_out, w_first,
                             compute_dtype, acc1_dtype):
    # a_ref   : (C_out*H_out, cihi_p)          kron(channel_mix, Rh), zero-padded cols
    # rwt_ref : (w_in, w_out)                  Rw^T
    # x_ref   : (b_tile*cihi_p, w_in)          image tile, native dtype
    # o_ref   : (b_tile, C_out*H_out, w_out)   output tile
    a = a_ref[...]
    rwt = rwt_ref[...]
    x2d = x_ref[...]

    if w_first:
        # (1) one stacked W-resize matmul over the whole tile (M = b*cihi_p).
        t2d = jnp.dot(x2d.astype(compute_dtype), rwt,
                      preferred_element_type=acc1_dtype)       # (b*cihi_p, w_out)
        # (2) regroup per-image slabs along lanes -> (cihi_p, b*w_out) so the
        #     shared A sees ONE wide matmul (N = b*w_out) instead of b small ones.
        if b_tile > 1:
            t_wide = jnp.concatenate(
                [t2d[b * cihi_p:(b + 1) * cihi_p, :] for b in range(b_tile)],
                axis=1)
        else:
            t_wide = t2d
        y = jnp.dot(a, t_wide.astype(compute_dtype),
                    preferred_element_type=jnp.float32)        # (cohout, b*w_out)
        for b in range(b_tile):
            o_ref[b] = y[:, b * w_out:(b + 1) * w_out].astype(o_ref.dtype)
    else:
        # A-first order (fewer FLOPs e.g. when upscaling W): regroup the INPUT
        # along lanes so A sees one wide matmul (N = b*w_in).
        if b_tile > 1:
            x_wide = jnp.concatenate(
                [x2d[b * cihi_p:(b + 1) * cihi_p, :].astype(compute_dtype)
                 for b in range(b_tile)],
                axis=1)                                        # (cihi_p, b*w_in)
        else:
            x_wide = x2d.astype(compute_dtype)
        y_wide = jnp.dot(a, x_wide,
                         preferred_element_type=acc1_dtype)    # (cohout, b*w_in)
        for b in range(b_tile):
            yb = y_wide[:, b * w_in:(b + 1) * w_in].astype(compute_dtype)
            o_ref[b] = jnp.dot(
                yb, rwt, preferred_element_type=jnp.float32).astype(o_ref.dtype)


def image_preprocess(imgs, *, height, width, num_channels,
                     resize_method="interpolate",
                     compute_dtype=jnp.float32, out_dtype=jnp.float32):
    """Pallas equivalent of _ImagePreprocessing.forward for a batched NCHW tensor."""
    imgs = jnp.asarray(imgs)                  # keep native dtype; cast in-kernel
    assert imgs.ndim == 4, "expected a stacked (N, C, H, W) batch"
    n, c_in, h_in, w_in = imgs.shape
    c_out = num_channels
    out_h, out_w = height, width
    out_dtype = jnp.float32 if out_dtype is None else out_dtype

    # Fast path: nothing to do -> return the input unchanged (torch semantics).
    if h_in == out_h and w_in == out_w and c_in == c_out:
        return imgs

    # --- host-side matrices --------------------------------------------------
    if h_in == out_h and w_in == out_w:
        rh = np.eye(out_h, dtype=np.float32)          # torch skips resize entirely
        rw = np.eye(out_w, dtype=np.float32)
    elif resize_method == "interpolate":
        rh = _bilinear_resize_matrix(out_h, h_in)
        rw = _bilinear_resize_matrix(out_w, w_in)
    elif resize_method == "crop_or_pad":
        rh = _crop_or_pad_matrix(out_h, h_in)
        rw = _crop_or_pad_matrix(out_w, w_in)
    else:
        raise ValueError(f"unsupported resize_method: {resize_method}")

    gw = _channel_matrix(c_in, c_out)
    a_np = np.kron(gw, rh)                            # (c_out*out_h, c_in*h_in)
    rwt_np = np.ascontiguousarray(rw.T)               # (w_in, out_w)

    cihi = c_in * h_in
    cohout = c_out * out_h

    in_itemsize = jnp.dtype(imgs.dtype).itemsize
    cd_itemsize = jnp.dtype(compute_dtype).itemsize
    out_itemsize = jnp.dtype(out_dtype).itemsize

    # Pad C_in*H_in up to the input dtype's sublane tile so the stacked 2D slab
    # (b_tile*cihi_p, w_in) is always layout-aligned -> no per-image fallback.
    align = {1: 32, 2: 16}.get(in_itemsize, 8)
    cihi_p = ((cihi + align - 1) // align) * align
    if cihi_p != cihi:
        a_np = np.pad(a_np, ((0, 0), (0, cihi_p - cihi)))     # zero cols -> no-op
        x3 = jnp.pad(imgs.reshape(n, cihi, w_in),
                     ((0, 0), (0, cihi_p - cihi), (0, 0)))
        x_in = x3.reshape(n * cihi_p, w_in)
    else:
        x_in = imgs.reshape(n * cihi, w_in)                   # free reshape

    # --- matmul order: minimize MXU MACs per image ---------------------------
    macs_w_first = cihi_p * w_in * out_w + cohout * cihi_p * out_w
    macs_a_first = cohout * cihi_p * w_in + cohout * w_in * out_w
    w_first = macs_w_first <= macs_a_first

    # --- batch-tile sizing from per-generation VMEM --------------------------
    vmem_cap = _vmem_capacity_bytes()
    budget = min(vmem_cap // 2, 64 << 20)

    def _vmem_est(b):
        in_blk = b * cihi_p * w_in * in_itemsize
        out_blk = b * cohout * out_w * out_itemsize
        mats = (cohout * cihi_p + w_in * out_w) * cd_itemsize
        wmax = max(w_in, out_w)
        interm = b * (cihi_p * w_in * cd_itemsize          # casted input copy
                      + 2 * cihi_p * wmax * 4              # matmul-1 result + regroup
                      + cohout * wmax * 4)                 # f32 matmul-2 result
        return 2 * (in_blk + out_blk) + 2 * mats + interm

    # >=2 grid steps whenever n >= 2 so both v7x TensorCores get work; cap the
    # static unroll at 32 images per tile.
    max_bt = 1 if n <= 1 else min(32, pl.cdiv(n, 2))
    b_tile = 1
    for b in range(max_bt, 0, -1):
        if _vmem_est(b) <= budget:
            b_tile = b
            break
    num_steps = pl.cdiv(n, b_tile)
    b_tile = min(b_tile, pl.cdiv(n, num_steps))           # balance the ragged tail
    num_steps = pl.cdiv(n, b_tile)

    vmem_limit = int(max(32 << 20, _vmem_est(b_tile) + (8 << 20)))
    vmem_limit = int(min(vmem_limit, vmem_cap - (16 << 20)))
    vmem_limit = int(max(vmem_limit, 24 << 20))

    acc1_dtype = (jnp.bfloat16
                  if jnp.dtype(compute_dtype) == jnp.dtype(jnp.bfloat16)
                  else jnp.float32)

    kernel = partial(_image_preprocess_kernel,
                     b_tile=b_tile, cihi_p=cihi_p, w_in=w_in, w_out=out_w,
                     w_first=w_first, compute_dtype=compute_dtype,
                     acc1_dtype=acc1_dtype)

    macs = n * (macs_w_first if w_first else macs_a_first)
    cost = pl.CostEstimate(
        flops=int(2 * macs),
        transcendentals=0,
        bytes_accessed=int(imgs.size * in_itemsize
                           + n * cohout * out_w * out_itemsize
                           + (a_np.size + rwt_np.size) * cd_itemsize))

    a_dev = jnp.asarray(a_np, dtype=compute_dtype)
    rwt_dev = jnp.asarray(rwt_np, dtype=compute_dtype)

    def _call(single_buffer_mats):
        mat_kw = {"pipeline_mode": pl.Buffered(1)} if single_buffer_mats else {}
        in_specs = [
            pl.BlockSpec((cohout, cihi_p), lambda i: (0, 0), **mat_kw),   # A (resident)
            pl.BlockSpec((w_in, out_w), lambda i: (0, 0), **mat_kw),      # Rw^T (resident)
            pl.BlockSpec((b_tile * cihi_p, w_in), lambda i: (i, 0)),      # image tile
        ]
        out_specs = pl.BlockSpec((b_tile, cohout, out_w), lambda i: (i, 0, 0))
        return pl.pallas_call(
            kernel,
            out_shape=jax.ShapeDtypeStruct((n, cohout, out_w), out_dtype),
            grid=(num_steps,),
            in_specs=in_specs,
            out_specs=out_specs,
            compiler_params=pltpu.CompilerParams(
                dimension_semantics=("parallel",),
                vmem_limit_bytes=vmem_limit),
            cost_estimate=cost,
        )(a_dev, rwt_dev, x_in)

    try:
        out = _call(True)      # single-buffered resident matrices
    except Exception:
        out = _call(False)     # fall back to default double-buffering

    return out.reshape(n, c_out, out_h, out_w)


# ---------------------------------------------------------------------------
# Self-test
# ---------------------------------------------------------------------------
if __name__ == "__main__":
    keys = jax.random.split(jax.random.PRNGKey(0), 6)

    def ref_preprocess(x, height, width, num_channels, resize_method="interpolate"):
        _, c, h, w = x.shape
        if h == height and w == width:
            rh = np.eye(height, dtype=np.float32)
            rw = np.eye(width, dtype=np.float32)
        elif resize_method == "interpolate":
            rh = _bilinear_resize_matrix(height, h)
            rw = _bilinear_resize_matrix(width, w)
        else:
            rh = _crop_or_pad_matrix(height, h)
            rw = _crop_or_pad_matrix(width, w)
        gw = _channel_matrix(c, num_channels)
        return jnp.einsum("kc,oh,pw,nchw->nkop",
                          jnp.asarray(gw), jnp.asarray(rh), jnp.asarray(rw),
                          x.astype(jnp.float32))

    # Case 1: f32, bilinear 16->8 downscale + grayscale (A-first order, b_tile=2).
    x1 = jax.random.uniform(keys[0], (4, 3, 16, 16), dtype=jnp.float32) * 255.0
    o1 = jax.block_until_ready(image_preprocess(
        x1, height=8, width=8, num_channels=1))
    r1 = ref_preprocess(x1, 8, 8, 1)
    assert o1.shape == (4, 1, 8, 8)
    assert jnp.allclose(o1, r1, atol=2e-2, rtol=1e-3), "case 1 mismatch"

    # Case 2: uint8 input, 32->16 downscale, 3 channels, ragged batch of 3
    # (W-first order, partial last grid block).
    x2 = jax.random.randint(keys[1], (3, 3, 32, 32), 0, 256,
                            dtype=jnp.int32).astype(jnp.uint8)
    o2 = jax.block_until_ready(image_preprocess(
        x2, height=16, width=16, num_channels=3))
    r2 = ref_preprocess(x2, 16, 16, 3)
    assert o2.shape == (3, 3, 16, 16)
    assert jnp.allclose(o2, r2, atol=5e-2, rtol=1e-3), "case 2 mismatch"

    # Case 3: crop_or_pad with unaligned C*H (3*20=60 -> padded to 64), batch 4.
    x3 = jax.random.uniform(keys[2], (4, 3, 20, 12), dtype=jnp.float32) * 255.0
    o3 = jax.block_until_ready(image_preprocess(
        x3, height=16, width=16, num_channels=3, resize_method="crop_or_pad"))
    r3 = ref_preprocess(x3, 16, 16, 3, "crop_or_pad")
    assert o3.shape == (4, 3, 16, 16)
    assert jnp.allclose(o3, r3, atol=1e-3, rtol=1e-4), "case 3 mismatch"

    # Case 4: 1 -> 3 channel zero-pad, no spatial resize.
    x4 = jax.random.uniform(keys[3], (2, 1, 16, 16), dtype=jnp.float32)
    o4 = jax.block_until_ready(image_preprocess(
        x4, height=16, width=16, num_channels=3))
    assert o4.shape == (2, 3, 16, 16)
    assert jnp.allclose(o4[:, 0], x4[:, 0], atol=1e-5), "case 4 passthrough"
    assert jnp.allclose(o4[:, 1:], 0.0), "case 4 zero pad"

    # Case 5: bf16 compute + bf16 output dtype (loose tolerance, doc'd double-rounding).
    o5 = jax.block_until_ready(image_preprocess(
        x2, height=16, width=16, num_channels=3,
        compute_dtype=jnp.bfloat16, out_dtype=jnp.bfloat16))
    assert o5.dtype == jnp.bfloat16
    assert jnp.allclose(o5.astype(jnp.float32), r2, atol=6.0, rtol=5e-2), "case 5"

    # Case 6: full identity fast path (input returned unchanged).
    x6 = jax.random.uniform(keys[4], (2, 3, 8, 8), dtype=jnp.float32)
    o6 = image_preprocess(x6, height=8, width=8, num_channels=3)
    assert jnp.array_equal(o6, x6), "case 6 identity"

    print("KERNEL_OK")
</pallas_src>

<mosaic_0001>
module attributes {stable_mosaic.version = 11 : i64} {
  func.func @_image_preprocess_kernel(%arg0: i32, %arg1: memref<8x48xf32, #tpu.memory_space<vmem>>, %arg2: memref<16x8xf32, #tpu.memory_space<vmem>>, %arg3: memref<96x16xf32, #tpu.memory_space<vmem>>, %arg4: memref<2x8x8xf32, #tpu.memory_space<vmem>>) attributes {dimension_semantics = [#tpu.dimension_semantics<parallel>], iteration_bounds = array<i64: 2>, scalar_prefetch = 0 : i64, scratch_operands = 0 : i64, tpu.core_type = #tpu.core_type<tc>, window_params = [{pipeline_mode = #tpu.pipeline_mode<synchronous>, transform_indices = @transform_0, window_bounds = array<i64: 8, 48>}, {pipeline_mode = #tpu.pipeline_mode<synchronous>, transform_indices = @transform_1, window_bounds = array<i64: 16, 8>}, {transform_indices = @transform_2, window_bounds = array<i64: 96, 16>}, {transform_indices = @transform_3, window_bounds = array<i64: 2, 8, 8>}]} {
    %c0 = arith.constant 0 : index
    %c0_0 = arith.constant 0 : index
    %0 = vector.load %arg1[%c0, %c0_0] : memref<8x48xf32, #tpu.memory_space<vmem>>, vector<8x48xf32>
    %c0_1 = arith.constant 0 : index
    %c0_2 = arith.constant 0 : index
    %1 = vector.load %arg2[%c0_1, %c0_2] : memref<16x8xf32, #tpu.memory_space<vmem>>, vector<16x8xf32>
    %c0_3 = arith.constant 0 : index
    %c0_4 = arith.constant 0 : index
    %2 = vector.load %arg3[%c0_3, %c0_4] : memref<96x16xf32, #tpu.memory_space<vmem>>, vector<96x16xf32>
    %3 = vector.extract_strided_slice %2 {offsets = [0, 0], sizes = [48, 16], strides = [1, 1]} : vector<96x16xf32> to vector<48x16xf32>
    %4 = vector.extract_strided_slice %2 {offsets = [48, 0], sizes = [48, 16], strides = [1, 1]} : vector<96x16xf32> to vector<48x16xf32>
    %5 = tpu.concatenate %3, %4 in 1 : vector<48x16xf32>, vector<48x16xf32> -> vector<48x32xf32>
    %cst = arith.constant dense<0.000000e+00> : vector<8x32xf32>
    %6 = tpu.matmul %0, %5, %cst {dimension_numbers = #tpu.dot_dimension_numbers<[1], [0], [0], [1], [0, 0, 1, 1], [], []>} : vector<8x48xf32>, vector<48x32xf32>, vector<8x32xf32> -> vector<8x32xf32>
    %7 = vector.extract_strided_slice %6 {offsets = [0, 0], sizes = [8, 16], strides = [1, 1]} : vector<8x32xf32> to vector<8x16xf32>
    %cst_5 = arith.constant dense<0.000000e+00> : vector<8x8xf32>
    %8 = tpu.matmul %7, %1, %cst_5 {dimension_numbers = #tpu.dot_dimension_numbers<[1], [0], [0], [1], [0, 0, 1, 1], [], []>} : vector<8x16xf32>, vector<16x8xf32>, vector<8x8xf32> -> vector<8x8xf32>
    %c0_6 = arith.constant 0 : index
    %c0_7 = arith.constant 0 : index
    %c0_8 = arith.constant 0 : index
    %9 = vector.load %arg4[%c0_6, %c0_7, %c0_8] : memref<2x8x8xf32, #tpu.memory_space<vmem>>, vector<1x8x8xf32>
    %10 = vector.shape_cast %9 : vector<1x8x8xf32> to vector<8x8xf32>
    %11 = vector.shape_cast %8 : vector<8x8xf32> to vector<1x8x8xf32>
    tpu.vector_store %arg4[%c0_6, %c0_7, %c0_8], %11 {strides = array<i32>} : memref<2x8x8xf32, #tpu.memory_space<vmem>>, vector<1x8x8xf32>,
    %12 = vector.extract_strided_slice %6 {offsets = [0, 16], sizes = [8, 16], strides = [1, 1]} : vector<8x32xf32> to vector<8x16xf32>
    %cst_9 = arith.constant dense<0.000000e+00> : vector<8x8xf32>
    %13 = tpu.matmul %12, %1, %cst_9 {dimension_numbers = #tpu.dot_dimension_numbers<[1], [0], [0], [1], [0, 0, 1, 1], [], []>} : vector<8x16xf32>, vector<16x8xf32>, vector<8x8xf32> -> vector<8x8xf32>
    %c1 = arith.constant 1 : index
    %c0_10 = arith.constant 0 : index
    %c0_11 = arith.constant 0 : index
    %14 = vector.load %arg4[%c1, %c0_10, %c0_11] : memref<2x8x8xf32, #tpu.memory_space<vmem>>, vector<1x8x8xf32>
    %15 = vector.shape_cast %14 : vector<1x8x8xf32> to vector<8x8xf32>
    %16 = vector.shape_cast %13 : vector<8x8xf32> to vector<1x8x8xf32>
    tpu.vector_store %arg4[%c1, %c0_10, %c0_11], %16 {strides = array<i32>} : memref<2x8x8xf32, #tpu.memory_space<vmem>>, vector<1x8x8xf32>,
    return
  }
  func.func @transform_0(%arg0: i32) -> (i32, i32) {
    %c0_i32 = arith.constant 0 : i32
    %c0_i32_0 = arith.constant 0 : i32
    %c0_i32_1 = arith.constant 0 : i32
    return %c0_i32, %c0_i32_0 : i32, i32
  }
  func.func @transform_1(%arg0: i32) -> (i32, i32) {
    %c0_i32 = arith.constant 0 : i32
    %c0_i32_0 = arith.constant 0 : i32
    %c0_i32_1 = arith.constant 0 : i32
    return %c0_i32, %c0_i32_0 : i32, i32
  }
  func.func @transform_2(%arg0: i32) -> (i32, i32) {
    %c0_i32 = arith.constant 0 : i32
    %c0_i32_0 = arith.constant 0 : i32
    return %arg0, %c0_i32 : i32, i32
  }
  func.func @transform_3(%arg0: i32) -> (i32, i32, i32) {
    %c0_i32 = arith.constant 0 : i32
    %c0_i32_0 = arith.constant 0 : i32
    %c0_i32_1 = arith.constant 0 : i32
    return %arg0, %c0_i32, %c0_i32_0 : i32, i32, i32
  }
}

module attributes {stable_mosaic.version = 11 : i64} {
  func.func @_image_preprocess_kernel(%arg0: i32, %arg1: memref<8x48xf32, #tpu.memory_space<vmem>>, %arg2: memref<16x8xf32, #tpu.memory_space<vmem>>, %arg3: memref<96x16xf32, #tpu.memory_space<vmem>>, %arg4: memref<2x8x8xf32, #tpu.memory_space<vmem>>) attributes {dimension_semantics = [#tpu.dimension_semantics<parallel>], iteration_bounds = array<i64: 2>, scalar_prefetch = 0 : i64, scratch_operands = 0 : i64, tpu.core_type = #tpu.core_type<tc>, window_params = [{pipeline_mode = #tpu.pipeline_mode<synchronous>, transform_indices = @transform_0, window_bounds = array<i64: 8, 48>}, {pipeline_mode = #tpu.pipeline_mode<synchronous>, transform_indices = @transform_1, window_bounds = array<i64: 16, 8>}, {transform_indices = @transform_2, window_bounds = array<i64: 96, 16>}, {transform_indices = @transform_3, window_bounds = array<i64: 2, 8, 8>}]} {
    %c0 = arith.constant 0 : index
    %c0_0 = arith.constant 0 : index
    %0 = vector.load %arg1[%c0, %c0_0] : memref<8x48xf32, #tpu.memory_space<vmem>>, vector<8x48xf32>
    %c0_1 = arith.constant 0 : index
    %c0_2 = arith.constant 0 : index
    %1 = vector.load %arg2[%c0_1, %c0_2] : memref<16x8xf32, #tpu.memory_space<vmem>>, vector<16x8xf32>
    %c0_3 = arith.constant 0 : index
    %c0_4 = arith.constant 0 : index
    %2 = vector.load %arg3[%c0_3, %c0_4] : memref<96x16xf32, #tpu.memory_space<vmem>>, vector<96x16xf32>
    %3 = vector.extract_strided_slice %2 {offsets = [0, 0], sizes = [48, 16], strides = [1, 1]} : vector<96x16xf32> to vector<48x16xf32>
    %4 = vector.extract_strided_slice %2 {offsets = [48, 0], sizes = [48, 16], strides = [1, 1]} : vector<96x16xf32> to vector<48x16xf32>
    %5 = tpu.concatenate %3, %4 in 1 : vector<48x16xf32>, vector<48x16xf32> -> vector<48x32xf32>
    %cst = arith.constant dense<0.000000e+00> : vector<8x32xf32>
    %6 = tpu.matmul %0, %5, %cst {dimension_numbers = #tpu.dot_dimension_numbers<[1], [0], [0], [1], [0, 0, 1, 1], [], []>} : vector<8x48xf32>, vector<48x32xf32>, vector<8x32xf32> -> vector<8x32xf32>
    %7 = vector.extract_strided_slice %6 {offsets = [0, 0], sizes = [8, 16], strides = [1, 1]} : vector<8x32xf32> to vector<8x16xf32>
    %cst_5 = arith.constant dense<0.000000e+00> : vector<8x8xf32>
    %8 = tpu.matmul %7, %1, %cst_5 {dimension_numbers = #tpu.dot_dimension_numbers<[1], [0], [0], [1], [0, 0, 1, 1], [], []>} : vector<8x16xf32>, vector<16x8xf32>, vector<8x8xf32> -> vector<8x8xf32>
    %c0_6 = arith.constant 0 : index
    %c0_7 = arith.constant 0 : index
    %c0_8 = arith.constant 0 : index
    %9 = vector.load %arg4[%c0_6, %c0_7, %c0_8] : memref<2x8x8xf32, #tpu.memory_space<vmem>>, vector<1x8x8xf32>
    %10 = vector.shape_cast %9 : vector<1x8x8xf32> to vector<8x8xf32>
    %11 = vector.shape_cast %8 : vector<8x8xf32> to vector<1x8x8xf32>
    tpu.vector_store %arg4[%c0_6, %c0_7, %c0_8], %11 {strides = array<i32>} : memref<2x8x8xf32, #tpu.memory_space<vmem>>, vector<1x8x8xf32>,
    %12 = vector.extract_strided_slice %6 {offsets = [0, 16], sizes = [8, 16], strides = [1, 1]} : vector<8x32xf32> to vector<8x16xf32>
    %cst_9 = arith.constant dense<0.000000e+00> : vector<8x8xf32>
    %13 = tpu.matmul %12, %1, %cst_9 {dimension_numbers = #tpu.dot_dimension_numbers<[1], [0], [0], [1], [0, 0, 1, 1], [], []>} : vector<8x16xf32>, vector<16x8xf32>, vector<8x8xf32> -> vector<8x8xf32>
    %c1 = arith.constant 1 : index
    %c0_10 = arith.constant 0 : index
    %c0_11 = arith.constant 0 : index
    %14 = vector.load %arg4[%c1, %c0_10, %c0_11] : memref<2x8x8xf32, #tpu.memory_space<vmem>>, vector<1x8x8xf32>
    %15 = vector.shape_cast %14 : vector<1x8x8xf32> to vector<8x8xf32>
    %16 = vector.shape_cast %13 : vector<8x8xf32> to vector<1x8x8xf32>
    tpu.vector_store %arg4[%c1, %c0_10, %c0_11], %16 {strides = array<i32>} : memref<2x8x8xf32, #tpu.memory_space<vmem>>, vector<1x8x8xf32>,
    return
  }
  func.func @transform_0(%arg0: i32) -> (i32, i32) {
    %c0_i32 = arith.constant 0 : i32
    %c0_i32_0 = arith.constant 0 : i32
    %c0_i32_1 = arith.constant 0 : i32
    return %c0_i32, %c0_i32_0 : i32, i32
  }
  func.func @transform_1(%arg0: i32) -> (i32, i32) {
    %c0_i32 = arith.constant 0 : i32
    %c0_i32_0 = arith.constant 0 : i32
    %c0_i32_1 = arith.constant 0 : i32
    return %c0_i32, %c0_i32_0 : i32, i32
  }
  func.func @transform_2(%arg0: i32) -> (i32, i32) {
    %c0_i32 = arith.constant 0 : i32
    %c0_i32_0 = arith.constant 0 : i32
    return %arg0, %c0_i32 : i32, i32
  }
  func.func @transform_3(%arg0: i32) -> (i32, i32, i32) {
    %c0_i32 = arith.constant 0 : i32
    %c0_i32_0 = arith.constant 0 : i32
    %c0_i32_1 = arith.constant 0 : i32
    return %arg0, %c0_i32, %c0_i32_0 : i32, i32, i32
  }
}

</mosaic_0001>

<bundles_post_ra>
// kernel: tpu_custom_call.1
= control target key start
LH: loop header
LB: loop body
LE: loop exit
PB: predicated region body
PF: predicated region fallthrough
CT: control target
= control target key end

     0   :  { %8 = vsyncpa [#allocation3], 0  ;;  %s881_s0 = inlined_call_operand.vmem [shape: f32[8,48], index: 0, kind: input, shape index: {}]   ;;  %s882_s1 = inlined_call_operand.vmem [shape: f32[16,8], index: 1, kind: input, shape index: {}]   ;;  %s883_s2 = inlined_call_operand.vmem [shape: f32[192,16], index: 2, kind: input, shape index: {}]   ;;  %s884_s3 = inlined_call_operand.hbm [shape: f32[4,8,8], index: 3, kind: output, shape index: {}]  }
   0x1   :  { %10 = vsyncpa [#allocation3 + $0x1], 0  ;;  %s745_s12 = smov 0   ;;  %s747_s13 = smov 0  }
   0x2   :  { %s749_s14 = smov 0   ;;  %s751_s15 = smov 0  }
   0x3 LB: > { %s766_s16 = sadd.s32 4294967295, %s715_s15   ;;  %s519_s17 = sadd.s32 4294967294, %s715_s15   ;;  %s715_s15 = sphi %s751_s15, %s890_s15   ;;  %s711_s14 = sphi %s749_s14, %s889_s14   ;;  %s707_s13 = sphi %s747_s13, %s888_s13   ;;  %s703_s12 = sphi %s745_s12, %s887_s12  }
   0x4   : > { %s770_s18 = sadd.s32 1, %s715_s15   ;;  %s91_s19 = sadd.s32 1, %s711_s14 }
   0x5   : > { %s88_s20 = ssub.s32 %s715_s15, %s770_s18  ;;  %p101_p0 = scmp.ne.s32.totalorder %s711_s14, %s707_s13 }
   0x6   : > { %p89_p1 = scmp.eq.s32.totalorder %s88_s20, 0  ;;  %p102_p2 = scmp.eq.s32.totalorder %s766_s16, 1 }
   0x7   : > { %p107_p3 = scmp.ne.s32.totalorder %s707_s13, %s703_s12  ;;  %p108_p4 = scmp.eq.s32.totalorder %s519_s17, 1 }
   0x8   : > { %s781_s21 = scalar_select %p89_p1, %s711_s14, %s91_s19  }
   0x9   : > { %p783_p5 = por %p102_p2, %p101_p0  ;;  %p787_p6 = por %p108_p4, %p107_p3 }
   0xa   : > { %p522_p7 = scmp.ge.s32.totalorder %s715_s15, 1  ;;  %p141_p8 = scmp.lt.s32.totalorder %s715_s15, 3 }
   0xc   : > { %p142_p9 = pnand %p522_p7, %p141_p8 }
   0xd   : > { %s165_s24 = smul.u32 (!%p142_p9), 12, %s766_s16  ;;  %v717_v0 = vmov (!%p142_p9), 0.0|0.0   ;;  %s718_s29 = smov (!%p142_p9), 16   ;;  %vm719_vm0 = vmmov (!%p142_p9), 0   ;;  %v720_v10 = vmov (!%p142_p9), 0.0   ;;  %v173_v11 = vld [vmem:[%s882_s1] sm:$0xff] (!%p142_p9) }
   0xe   : > { %145 = sbr.rel (%p142_p9) target bundleno = 712 (0x2c8), region = 32  ;;  %577 = vmatprep.subr.bf16.mxu0 (!%p142_p9), %v717_v0  ;;  %586 = vmatprep.subr.bf16.mxu1 (!%p142_p9), %v717_v0  ;;  %v174_v12 = vld [vmem:[%s882_s1 + $0x8] sm:$0xff] (!%p142_p9)  ;;  %vm211_vm1 = vcmask (!%p142_p9), 130048   ;;  %v172_v38 = vld [vmem:[%s881_s0] sm:$0xff] (!%p142_p9)  ;;  %vm218_vm2 = vcmask (!%p142_p9), 392192   ;;  %s721_s9 = smov (!%p142_p9), 112  }
   0xf   : > { %p166_p10 = scmp.lt.s32.totalorder (!%p142_p9), %s165_s24, 23  ;;  %560 = vmatprep.mubr.msk.f32.mxu0 (!%p142_p9), %vm719_vm0, %v720_v10  ;;  %567 = vmatprep.mubr.msk.f32.mxu1 (!%p142_p9), %vm719_vm0, %v720_v10  ;;  %v587_v13 = vpack.c.bf16 (!%p142_p9), %v174_v12, %v173_v11  ;;  %s162_s10 = sand.u32 (!%p142_p9), 1, %s707_s13   ;;  %vm365_vm3 = vcmask (!%p142_p9), 64512  }
  0x10   : > { %s523_s11 = sshll.u32 (!%p142_p9), %s162_s10, 4  ;;  %s534_s20 = sshll.u32 (!%p142_p9), %s766_s16, 8 }
  0x11   : > { %588 = vmatpush3.bf16.msra.mxu1 (!%p142_p9), %v587_v13  ;;  %s164_s17 = scalar_lea.vmem (!%p142_p9), [#allocation2], %s523_s11  ;;  %s838_s26 = scalar_lea.hbm (!%p142_p9), %s884_s3, %s534_s20 }
  0x12   : > { %589 = vmatprep.subr.bf16.mxu1 (!%p142_p9), %v717_v0  ;;  %s457_s19 = sshll.u32 (!%p142_p9), %s164_s17, 4  ;;  %s840_s27 = scalar_lea.sflag (!%p142_p9), [#allocation3], %s162_s10  ;;  %s833_s19 = int_to_ptr.vmem [resolvable:$true] %s457_s19 }
  0x13   : > { %s722_s16 = smov (!%p142_p9), [#allocation2]  }
  0x15   : > { %s892_s24 = smov (!%p166_p10, %s165_s24), 23 }
  0x16   : > { %s524_s25 = sshll.u32 %s892_s24, 3 }
  0x17   : > { %s797_s28 = scalar_lea.vmem %s883_s2, %s524_s25 }
  0x18   : > { %v181_v1 = vld [vmem:[%s797_s28 + $0x30] sm:$0xff]  ;;  %v182_v2 = vld [vmem:[%s797_s28 + $0x38] sm:$0xff]  ;;  %v183_v3 = vld [vmem:[%s797_s28 + $0x40] sm:$0xff] }
  0x19   : > { %v638_v4 = vpack.i.bf16 %v182_v2, %v181_v1  ;;  %v184_v5 = vld [vmem:[%s797_s28 + $0x48] sm:$0xff]  ;;  %v185_v6 = vld [vmem:[%s797_s28 + $0x50] sm:$0xff]  ;;  %v186_v7 = vld [vmem:[%s797_s28 + $0x58] sm:$0xff] }
  0x1a   : > { %v648_v8 = vpack.i.bf16 %v186_v7, %v185_v6  ;;  %v643_v9 = vpack.i.bf16 %v184_v5, %v183_v3  ;;  %v175_v15 = vld [vmem:[%s797_s28] sm:$0xff]  ;;  %v176_v16 = vld [vmem:[%s797_s28 + $0x8] sm:$0xff]  ;;  %v177_v24 = vld [vmem:[%s797_s28 + $0x10] sm:$0xff] }
  0x1b   : > { %639 = vrot.lane.b32.xlu0 %v638_v4, %s718_s29  ;;  %v178_v27 = vld [vmem:[%s797_s28 + $0x18] sm:$0xff]  ;;  %v179_v28 = vld [vmem:[%s797_s28 + $0x20] sm:$0xff]  ;;  %v180_v29 = vld [vmem:[%s797_s28 + $0x28] sm:$0xff]  ;;  %s653_s28 = scalar_lea.vmem %s833_s19, 256 }
  0x1c   : > { %649 = vrot.lane.b32.xlu1 %v648_v8, %s718_s29  ;;  %p654_p11 = scmp.ne.s32.totalorder %s833_s19, %s653_s28 }
  0x1e   : > { %p655_p12 = pnand %p654_p11, %p783_p5 }
  0x1f   : > { %644 = vrot.lane.b32.xlu0 %v643_v9, %s718_s29  ;;  %s657_s29 = sshll.u32 %s722_s16, 4  ;;  %s658_s29 = int_to_ptr.vmem [resolvable:$false] %s657_s29 }
  0x20   : > { %p656_p13 = pneg %p655_p12  ;;  %s659_s30 = scalar_lea.vmem %s658_s29, 512 }
  0x21   : > { %p660_p0 = scmp.lt.s32.totalorder %s833_s19, %s658_s29  ;;  %p661_p1 = scmp.lt.s32.totalorder %s659_s30, %s653_s28 }
  0x23   : > { %p662_p2 = por %p661_p1, %p660_p0 }
  0x25   : > { %p663_p3 = pnand %p662_p2, %p656_p13 }
  0x8d   : > { %v640_v14 = vpop.permute.xlu0 %639 }
  0x8e   : > { %v642_v17 = vunpack.i.h.bf16 %v640_v14  ;;  %v641_v18 = vunpack.i.l.bf16 %v640_v14  ;;  %v650_v19 = vpop.permute.xlu1 %649 }
  0x8f   : > { %v652_v22 = vunpack.i.h.bf16 %v650_v19  ;;  %v651_v23 = vunpack.i.l.bf16 %v650_v19 }
  0x90   : > { %v212_v20 = vsel %vm211_vm1, %v175_v15, %v641_v18  ;;  %v213_v21 = vsel %vm211_vm1, %v176_v16, %v642_v17 }
  0x91   : > { %v645_v25 = vpop.permute.xlu0 %644  ;;  %v578_v26 = vpack.c.bf16 %v213_v21, %v212_v20  ;;  %v216_v34 = vsel %vm211_vm1, %v179_v28, %v651_v23  ;;  %v217_v35 = vsel %vm211_vm1, %v180_v29, %v652_v22 }
  0x92   : > { %v647_v30 = vunpack.i.h.bf16 %v645_v25  ;;  %v646_v31 = vunpack.i.l.bf16 %v645_v25  ;;  %v584_v37 = vpack.c.bf16 %v217_v35, %v216_v34 }
  0x93   : > { %579 = vmatpush3.bf16.msra.mxu0 %v578_v26 }
  0x94   : > { %580 = vmatprep.subr.bf16.mxu0 %v717_v0  ;;  %v214_v32 = vsel %vm211_vm1, %v177_v24, %v646_v31  ;;  %v215_v33 = vsel %vm211_vm1, %v178_v27, %v647_v30 }
  0x95   : > { %v581_v36 = vpack.c.bf16 %v215_v33, %v214_v32 }
  0x97   : > { %582 = vmatpush3.bf16.msra.mxu0 %v581_v36 }
  0x98   : > { %583 = vmatprep.subr.bf16.mxu0 %v717_v0 }
  0x9b   : > { %585 = vmatpush3.bf16.msra.mxu0 %v584_v37 }
  0x9e   : > { %561 = vmatmul.mubr.msk.f32.vlgmr.msra.gmra.mrb[0].mxu0 %vm218_vm2, %v172_v38 }
 0x171   : > { %v288_v39 = vpop.f32.mrb[0].mxu0 }
 0x172   : > { %367 = vrot.lane.b32.xlu1 %v288_v39, %s721_s9  ;;  %v562_v40 = vpop.f32.mrb[1].mxu0  ;;  %568 = vmatmul.mubr.msk.f32.vlgmr.msra.gmra.mrb[0].mxu1 %vm211_vm1, %v288_v39 }
 0x173   : > { %591 = vmatpush3.bf16.msra.mxu1 %v587_v13  ;;  %574 = vmatprep.mubr.msk.f32.mxu1 %vm719_vm0, %v720_v10 }
 0x1e4   : > { %v368_v41 = vpop.permute.xlu1 %367 }
 0x1e5   : > { %575 = vmatmul.mubr.msk.f32.vlgmr.msra.gmra.mrb[2].mxu1 %vm211_vm1, %v368_v41 }
 0x245   : > { %v361_v42 = vpop.f32.mrb[0].mxu1 }
 0x246   : > { %366 = vst.msk [vmem:[%s164_s17] sm:$0xff] %vm365_vm3, %v361_v42  ;;  %v569_v43 = vpop.f32.mrb[1].mxu1 }
 0x2b8   : > { %v437_v44 = vpop.f32.mrb[2].mxu1 }
 0x2b9   : > { %528 = vst.msk [vmem:[%s164_s17 + $0x8] sm:$0xff] %vm365_vm3, %v437_v44  ;;  %v576_v45 = vpop.f32.mrb[3].mxu1 }
 0x2ba   : > { %666 = shalt.err (!%p663_p3)
}
 0x2bb   : > { %s667_s4 = scalar_lea.hbm %s838_s26, 256  ;;  %s671_s7 = scalar_lea.hbm %s884_s3, 512 }
 0x2bc   : > { %p668_p4 = scmp.ne.s32.totalorder %s838_s26, %s667_s4  ;;  %p672_p9 = scmp.lt.u32.totalorder %s838_s26, %s884_s3 }
 0x2bd   : > { %p673_p10 = scmp.lt.u32.totalorder %s671_s7, %s667_s4  ;;  %p675_p12 = scmp.lt.u32.totalorder %s667_s4, %s838_s26 }
 0x2be   : > { %p669_p7 = pnand %p668_p4, %p783_p5 }
 0x2bf   : > { %p674_p11 = por %p673_p10, %p672_p9 }
 0x2c0   : > { %p670_p8 = pneg %p669_p7 }
 0x2c1   : > { %p676_p13 = por %p675_p12, %p674_p11 }
 0x2c3   : > { %p677_p0 = pnand %p676_p13, %p670_p8 }
 0x2c5   : > { %680 = shalt.err (!%p677_p0)
}
 0x2c6   : > { %s723_s10 = smov 128   ;;  %s724_s11 = smov 8  }
 0x2c7   : > { %592 = dma.vmem_to_hbm [thread:$0]  (%p783_p5), %s833_s19, 256, %s838_s26, %s840_s27, %s723_s10, %s723_s10, %s724_s11  }
 0x2c8 PF: > { %p598_p1 = scmp.ge.s32.totalorder %s715_s15, 2  ;;  %s472_s17 = sand.u32 1, %s703_s12  }
 0x2c9   : > { %s473_s20 = scalar_lea.sflag [#allocation3], %s472_s17 }
 0x2ca   : > { %p595_p2 = pnand %p598_p1, %p787_p6 }
 0x2cc   : > { %698 = dma.done.wait (!%p595_p2), %s473_s20, 256  }
 0x2cd   : > { %700 = vsyncadd (!%p595_p2), %s473_s20, 4294967040  ;;  %p13_p3 = scmp.ge.s32.totalorder %s770_s18, 4   ;;  %s887_s12 = smov %s707_s13 }
 0x2ce   : > { %s888_s13 = smov %s711_s14  ;;  %s889_s14 = smov %s781_s21 }
 0x2cf   : > { %s890_s15 = smov %s770_s18  ;;  %15 = sbr.rel (!%p13_p3) target bundleno = 3 (0x3), region = 68 }
 0x2d6   :  { %478 = vsyncpa [#allocation3], 1 }
 0x2d7   :  { %480 = vsyncpa [#allocation3 + $0x1], 1 }

// kernel: tpu_custom_call.1
= control target key start
LH: loop header
LB: loop body
LE: loop exit
PB: predicated region body
PF: predicated region fallthrough
CT: control target
= control target key end

     0   :  { %8 = vsyncpa [#allocation3], 0  ;;  %s881_s0 = inlined_call_operand.vmem [shape: f32[8,48], index: 0, kind: input, shape index: {}]   ;;  %s882_s1 = inlined_call_operand.vmem [shape: f32[16,8], index: 1, kind: input, shape index: {}]   ;;  %s883_s2 = inlined_call_operand.vmem [shape: f32[192,16], index: 2, kind: input, shape index: {}]   ;;  %s884_s3 = inlined_call_operand.hbm [shape: f32[4,8,8], index: 3, kind: output, shape index: {}]  }
   0x1   :  { %10 = vsyncpa [#allocation3 + $0x1], 0  ;;  %s745_s12 = smov 0   ;;  %s747_s13 = smov 0  }
   0x2   :  { %s749_s14 = smov 0   ;;  %s751_s15 = smov 0  }
   0x3 LB: > { %s766_s16 = sadd.s32 4294967295, %s715_s15   ;;  %s519_s17 = sadd.s32 4294967294, %s715_s15   ;;  %s715_s15 = sphi %s751_s15, %s890_s15   ;;  %s711_s14 = sphi %s749_s14, %s889_s14   ;;  %s707_s13 = sphi %s747_s13, %s888_s13   ;;  %s703_s12 = sphi %s745_s12, %s887_s12  }
   0x4   : > { %s770_s18 = sadd.s32 1, %s715_s15   ;;  %s91_s19 = sadd.s32 1, %s711_s14 }
   0x5   : > { %s88_s20 = ssub.s32 %s715_s15, %s770_s18  ;;  %p101_p0 = scmp.ne.s32.totalorder %s711_s14, %s707_s13 }
   0x6   : > { %p89_p1 = scmp.eq.s32.totalorder %s88_s20, 0  ;;  %p102_p2 = scmp.eq.s32.totalorder %s766_s16, 1 }
   0x7   : > { %p107_p3 = scmp.ne.s32.totalorder %s707_s13, %s703_s12  ;;  %p108_p4 = scmp.eq.s32.totalorder %s519_s17, 1 }
   0x8   : > { %s781_s21 = scalar_select %p89_p1, %s711_s14, %s91_s19  }
   0x9   : > { %p783_p5 = por %p102_p2, %p101_p0  ;;  %p787_p6 = por %p108_p4, %p107_p3 }
   0xa   : > { %p522_p7 = scmp.ge.s32.totalorder %s715_s15, 1  ;;  %p141_p8 = scmp.lt.s32.totalorder %s715_s15, 3 }
   0xc   : > { %p142_p9 = pnand %p522_p7, %p141_p8 }
   0xd   : > { %s165_s24 = smul.u32 (!%p142_p9), 12, %s766_s16  ;;  %v717_v0 = vmov (!%p142_p9), 0.0|0.0   ;;  %s718_s29 = smov (!%p142_p9), 16   ;;  %vm719_vm0 = vmmov (!%p142_p9), 0   ;;  %v720_v10 = vmov (!%p142_p9), 0.0   ;;  %v173_v11 = vld [vmem:[%s882_s1] sm:$0xff] (!%p142_p9) }
   0xe   : > { %145 = sbr.rel (%p142_p9) target bundleno = 712 (0x2c8), region = 32  ;;  %577 = vmatprep.subr.bf16.mxu0 (!%p142_p9), %v717_v0  ;;  %586 = vmatprep.subr.bf16.mxu1 (!%p142_p9), %v717_v0  ;;  %v174_v12 = vld [vmem:[%s882_s1 + $0x8] sm:$0xff] (!%p142_p9)  ;;  %vm211_vm1 = vcmask (!%p142_p9), 130048   ;;  %v172_v38 = vld [vmem:[%s881_s0] sm:$0xff] (!%p142_p9)  ;;  %vm218_vm2 = vcmask (!%p142_p9), 392192   ;;  %s721_s9 = smov (!%p142_p9), 112  }
   0xf   : > { %p166_p10 = scmp.lt.s32.totalorder (!%p142_p9), %s165_s24, 23  ;;  %560 = vmatprep.mubr.msk.f32.mxu0 (!%p142_p9), %vm719_vm0, %v720_v10  ;;  %567 = vmatprep.mubr.msk.f32.mxu1 (!%p142_p9), %vm719_vm0, %v720_v10  ;;  %v587_v13 = vpack.c.bf16 (!%p142_p9), %v174_v12, %v173_v11  ;;  %s162_s10 = sand.u32 (!%p142_p9), 1, %s707_s13   ;;  %vm365_vm3 = vcmask (!%p142_p9), 64512  }
  0x10   : > { %s523_s11 = sshll.u32 (!%p142_p9), %s162_s10, 4  ;;  %s534_s20 = sshll.u32 (!%p142_p9), %s766_s16, 8 }
  0x11   : > { %588 = vmatpush3.bf16.msra.mxu1 (!%p142_p9), %v587_v13  ;;  %s164_s17 = scalar_lea.vmem (!%p142_p9), [#allocation2], %s523_s11  ;;  %s838_s26 = scalar_lea.hbm (!%p142_p9), %s884_s3, %s534_s20 }
  0x12   : > { %589 = vmatprep.subr.bf16.mxu1 (!%p142_p9), %v717_v0  ;;  %s457_s19 = sshll.u32 (!%p142_p9), %s164_s17, 4  ;;  %s840_s27 = scalar_lea.sflag (!%p142_p9), [#allocation3], %s162_s10  ;;  %s833_s19 = int_to_ptr.vmem [resolvable:$true] %s457_s19 }
  0x13   : > { %s722_s16 = smov (!%p142_p9), [#allocation2]  }
  0x15   : > { %s892_s24 = smov (!%p166_p10, %s165_s24), 23 }
  0x16   : > { %s524_s25 = sshll.u32 %s892_s24, 3 }
  0x17   : > { %s797_s28 = scalar_lea.vmem %s883_s2, %s524_s25 }
  0x18   : > { %v181_v1 = vld [vmem:[%s797_s28 + $0x30] sm:$0xff]  ;;  %v182_v2 = vld [vmem:[%s797_s28 + $0x38] sm:$0xff]  ;;  %v183_v3 = vld [vmem:[%s797_s28 + $0x40] sm:$0xff] }
  0x19   : > { %v638_v4 = vpack.i.bf16 %v182_v2, %v181_v1  ;;  %v184_v5 = vld [vmem:[%s797_s28 + $0x48] sm:$0xff]  ;;  %v185_v6 = vld [vmem:[%s797_s28 + $0x50] sm:$0xff]  ;;  %v186_v7 = vld [vmem:[%s797_s28 + $0x58] sm:$0xff] }
  0x1a   : > { %v648_v8 = vpack.i.bf16 %v186_v7, %v185_v6  ;;  %v643_v9 = vpack.i.bf16 %v184_v5, %v183_v3  ;;  %v175_v15 = vld [vmem:[%s797_s28] sm:$0xff]  ;;  %v176_v16 = vld [vmem:[%s797_s28 + $0x8] sm:$0xff]  ;;  %v177_v24 = vld [vmem:[%s797_s28 + $0x10] sm:$0xff] }
  0x1b   : > { %639 = vrot.lane.b32.xlu0 %v638_v4, %s718_s29  ;;  %v178_v27 = vld [vmem:[%s797_s28 + $0x18] sm:$0xff]  ;;  %v179_v28 = vld [vmem:[%s797_s28 + $0x20] sm:$0xff]  ;;  %v180_v29 = vld [vmem:[%s797_s28 + $0x28] sm:$0xff]  ;;  %s653_s28 = scalar_lea.vmem %s833_s19, 256 }
  0x1c   : > { %649 = vrot.lane.b32.xlu1 %v648_v8, %s718_s29  ;;  %p654_p11 = scmp.ne.s32.totalorder %s833_s19, %s653_s28 }
  0x1e   : > { %p655_p12 = pnand %p654_p11, %p783_p5 }
  0x1f   : > { %644 = vrot.lane.b32.xlu0 %v643_v9, %s718_s29  ;;  %s657_s29 = sshll.u32 %s722_s16, 4  ;;  %s658_s29 = int_to_ptr.vmem [resolvable:$false] %s657_s29 }
  0x20   : > { %p656_p13 = pneg %p655_p12  ;;  %s659_s30 = scalar_lea.vmem %s658_s29, 512 }
  0x21   : > { %p660_p0 = scmp.lt.s32.totalorder %s833_s19, %s658_s29  ;;  %p661_p1 = scmp.lt.s32.totalorder %s659_s30, %s653_s28 }
  0x23   : > { %p662_p2 = por %p661_p1, %p660_p0 }
  0x25   : > { %p663_p3 = pnand %p662_p2, %p656_p13 }
  0x8d   : > { %v640_v14 = vpop.permute.xlu0 %639 }
  0x8e   : > { %v642_v17 = vunpack.i.h.bf16 %v640_v14  ;;  %v641_v18 = vunpack.i.l.bf16 %v640_v14  ;;  %v650_v19 = vpop.permute.xlu1 %649 }
  0x8f   : > { %v652_v22 = vunpack.i.h.bf16 %v650_v19  ;;  %v651_v23 = vunpack.i.l.bf16 %v650_v19 }
  0x90   : > { %v212_v20 = vsel %vm211_vm1, %v175_v15, %v641_v18  ;;  %v213_v21 = vsel %vm211_vm1, %v176_v16, %v642_v17 }
  0x91   : > { %v645_v25 = vpop.permute.xlu0 %644  ;;  %v578_v26 = vpack.c.bf16 %v213_v21, %v212_v20  ;;  %v216_v34 = vsel %vm211_vm1, %v179_v28, %v651_v23  ;;  %v217_v35 = vsel %vm211_vm1, %v180_v29, %v652_v22 }
  0x92   : > { %v647_v30 = vunpack.i.h.bf16 %v645_v25  ;;  %v646_v31 = vunpack.i.l.bf16 %v645_v25  ;;  %v584_v37 = vpack.c.bf16 %v217_v35, %v216_v34 }
  0x93   : > { %579 = vmatpush3.bf16.msra.mxu0 %v578_v26 }
  0x94   : > { %580 = vmatprep.subr.bf16.mxu0 %v717_v0  ;;  %v214_v32 = vsel %vm211_vm1, %v177_v24, %v646_v31  ;;  %v215_v33 = vsel %vm211_vm1, %v178_v27, %v647_v30 }
  0x95   : > { %v581_v36 = vpack.c.bf16 %v215_v33, %v214_v32 }
  0x97   : > { %582 = vmatpush3.bf16.msra.mxu0 %v581_v36 }
  0x98   : > { %583 = vmatprep.subr.bf16.mxu0 %v717_v0 }
  0x9b   : > { %585 = vmatpush3.bf16.msra.mxu0 %v584_v37 }
  0x9e   : > { %561 = vmatmul.mubr.msk.f32.vlgmr.msra.gmra.mrb[0].mxu0 %vm218_vm2, %v172_v38 }
 0x171   : > { %v288_v39 = vpop.f32.mrb[0].mxu0 }
 0x172   : > { %367 = vrot.lane.b32.xlu1 %v288_v39, %s721_s9  ;;  %v562_v40 = vpop.f32.mrb[1].mxu0  ;;  %568 = vmatmul.mubr.msk.f32.vlgmr.msra.gmra.mrb[0].mxu1 %vm211_vm1, %v288_v39 }
 0x173   : > { %591 = vmatpush3.bf16.msra.mxu1 %v587_v13  ;;  %574 = vmatprep.mubr.msk.f32.mxu1 %vm719_vm0, %v720_v10 }
 0x1e4   : > { %v368_v41 = vpop.permute.xlu1 %367 }
 0x1e5   : > { %575 = vmatmul.mubr.msk.f32.vlgmr.msra.gmra.mrb[2].mxu1 %vm211_vm1, %v368_v41 }
 0x245   : > { %v361_v42 = vpop.f32.mrb[0].mxu1 }
 0x246   : > { %366 = vst.msk [vmem:[%s164_s17] sm:$0xff] %vm365_vm3, %v361_v42  ;;  %v569_v43 = vpop.f32.mrb[1].mxu1 }
 0x2b8   : > { %v437_v44 = vpop.f32.mrb[2].mxu1 }
 0x2b9   : > { %528 = vst.msk [vmem:[%s164_s17 + $0x8] sm:$0xff] %vm365_vm3, %v437_v44  ;;  %v576_v45 = vpop.f32.mrb[3].mxu1 }
 0x2ba   : > { %666 = shalt.err (!%p663_p3)
}
 0x2bb   : > { %s667_s4 = scalar_lea.hbm %s838_s26, 256  ;;  %s671_s7 = scalar_lea.hbm %s884_s3, 512 }
 0x2bc   : > { %p668_p4 = scmp.ne.s32.totalorder %s838_s26, %s667_s4  ;;  %p672_p9 = scmp.lt.u32.totalorder %s838_s26, %s884_s3 }
 0x2bd   : > { %p673_p10 = scmp.lt.u32.totalorder %s671_s7, %s667_s4  ;;  %p675_p12 = scmp.lt.u32.totalorder %s667_s4, %s838_s26 }
 0x2be   : > { %p669_p7 = pnand %p668_p4, %p783_p5 }
 0x2bf   : > { %p674_p11 = por %p673_p10, %p672_p9 }
 0x2c0   : > { %p670_p8 = pneg %p669_p7 }
 0x2c1   : > { %p676_p13 = por %p675_p12, %p674_p11 }
 0x2c3   : > { %p677_p0 = pnand %p676_p13, %p670_p8 }
 0x2c5   : > { %680 = shalt.err (!%p677_p0)
}
 0x2c6   : > { %s723_s10 = smov 128   ;;  %s724_s11 = smov 8  }
 0x2c7   : > { %592 = dma.vmem_to_hbm [thread:$0]  (%p783_p5), %s833_s19, 256, %s838_s26, %s840_s27, %s723_s10, %s723_s10, %s724_s11  }
 0x2c8 PF: > { %p598_p1 = scmp.ge.s32.totalorder %s715_s15, 2  ;;  %s472_s17 = sand.u32 1, %s703_s12  }
 0x2c9   : > { %s473_s20 = scalar_lea.sflag [#allocation3], %s472_s17 }
 0x2ca   : > { %p595_p2 = pnand %p598_p1, %p787_p6 }
 0x2cc   : > { %698 = dma.done.wait (!%p595_p2), %s473_s20, 256  }
 0x2cd   : > { %700 = vsyncadd (!%p595_p2), %s473_s20, 4294967040  ;;  %p13_p3 = scmp.ge.s32.totalorder %s770_s18, 4   ;;  %s887_s12 = smov %s707_s13 }
 0x2ce   : > { %s888_s13 = smov %s711_s14  ;;  %s889_s14 = smov %s781_s21 }
 0x2cf   : > { %s890_s15 = smov %s770_s18  ;;  %15 = sbr.rel (!%p13_p3) target bundleno = 3 (0x3), region = 68 }
 0x2d6   :  { %478 = vsyncpa [#allocation3], 1 }
 0x2d7   :  { %480 = vsyncpa [#allocation3 + $0x1], 1 }

</bundles_post_ra>
